<compile_context>
chip_gen: v7x
topology: tpu7x:2x2x1
jax: 0.10.0
libtpu: 0.0.40
codegen_flags: <defaults>
</compile_context>

<pallas_src>
import functools

import jax
import jax.numpy as jnp
from jax import lax
from jax.experimental import pallas as pl
from jax.experimental.pallas import tpu as pltpu

CURVATURE_C = 1.0  # PoincareBall default curvature


def _round_up(n, m):
    return (n + m - 1) // m * m


def _mobius_scale_and_bias(x_sq, mx, b):
    """Poincare-ball (c=1) mobius_matvec epilogue + Euclidean bias add.

    x_sq: (TB, 1)      f32 sum-of-squares of the input rows.
    mx:   (TB, O_pad)  f32 result of x @ W^T.
    b:    (1, O_pad)   f32 bias.
    """
    sqrt_c = float(CURVATURE_C) ** 0.5
    inv_sqrt_c = 1.0 / sqrt_c
    eps2 = jnp.float32(1e-30)                          # == (1e-15)**2 norm clamp

    mx_sq = jnp.sum(mx * mx, axis=-1, keepdims=True)   # (TB, 1)
    x_sq_c = jnp.maximum(x_sq, eps2)
    mx_sq_c = jnp.maximum(mx_sq, eps2)

    x_norm = jnp.sqrt(x_sq_c)
    mx_norm = jnp.sqrt(mx_sq_c)
    inv_x_norm = lax.rsqrt(x_sq_c)                     # EUP, replaces f32 divides
    inv_mx_norm = lax.rsqrt(mx_sq_c)

    # artanh(sqrt(c) * ||x||), standard clamp to the open ball.
    a = jnp.clip(sqrt_c * x_norm, -1.0 + 1e-7, 1.0 - 1e-7)
    artanh = 0.5 * jnp.log((1.0 + a) / (1.0 - a))

    scale = jnp.tanh(mx_norm * inv_x_norm * artanh) * (inv_mx_norm * inv_sqrt_c)
    # Rows where mx is exactly zero map to zero (mask only the (TB,1) column).
    scale = jnp.where(mx_sq == 0.0, jnp.float32(0.0), scale)
    return scale * mx + b


def _resident_kernel(x_ref, wt_ref, b_ref, o_ref, *, bf16_matmul):
    x = x_ref[...]                       # (TB, I)      f32
    wt = wt_ref[...]                     # (I, O_pad)   f32/bf16, VMEM-resident
    b = b_ref[...]                       # (1, O_pad)   f32, VMEM-resident
    lhs = x.astype(jnp.bfloat16) if bf16_matmul else x
    mx = jnp.dot(lhs, wt, preferred_element_type=jnp.float32)   # (TB, O_pad)
    x_sq = jnp.sum(x * x, axis=-1, keepdims=True)               # f32 norm of f32 x
    o_ref[...] = _mobius_scale_and_bias(x_sq, mx, b).astype(o_ref.dtype)


def _ktiled_kernel(x_ref, wt_ref, b_ref, o_ref, acc_ref, xsq_ref, *, bf16_matmul):
    k = pl.program_id(1)

    @pl.when(k == 0)
    def _():
        acc_ref[...] = jnp.zeros_like(acc_ref)
        xsq_ref[...] = jnp.zeros_like(xsq_ref)

    x = x_ref[...]                       # (TB, TK)     f32
    wt = wt_ref[...]                     # (TK, O_pad)  f32/bf16, streamed
    lhs = x.astype(jnp.bfloat16) if bf16_matmul else x
    acc_ref[...] += jnp.dot(lhs, wt, preferred_element_type=jnp.float32)
    xsq_ref[...] += jnp.sum(x * x, axis=-1, keepdims=True)

    @pl.when(k == pl.num_programs(1) - 1)
    def _():
        o_ref[...] = _mobius_scale_and_bias(
            xsq_ref[...], acc_ref[...], b_ref[...]).astype(o_ref.dtype)


def _vmem_budget_bytes():
    """Generation-aware VMEM ask: capacity minus headroom, capped at 110 MiB."""
    cap = 64 * 1024 * 1024
    try:
        cap = int(pltpu.get_tpu_info().vmem_capacity_bytes)
    except Exception:
        pass
    return int(min(max(cap - (12 << 20), 16 << 20), 110 << 20))


def hyperbolic_linear(x, W, bias, *, use_bf16_matmul=False,
                      out_dtype=jnp.float32, force_path=None):
    """x: (B, I), W: (O, I), bias: (O,) -> (B, O)."""
    B, I = x.shape
    O, I_w = W.shape
    assert I_w == I and bias.shape == (O,)

    out_dtype = jnp.dtype(out_dtype)
    w_dtype = jnp.bfloat16 if use_bf16_matmul else jnp.float32
    w_elem = jnp.dtype(w_dtype).itemsize
    out_elem = out_dtype.itemsize

    O_pad = _round_up(O, 128)            # lane-dense, unmasked output stores
    rows = _round_up(B, 8)

    # W^T prepared once in the wrapper: transpose + (optional) bf16 + padding.
    w_t = W.astype(w_dtype).T            # (I, O)
    b_p = bias.astype(jnp.float32)
    if O_pad != O:
        w_t = jnp.pad(w_t, ((0, 0), (0, O_pad - O)))   # zero cols -> zero outputs
        b_p = jnp.pad(b_p, (0, O_pad - O))
    b_p = b_p.reshape(1, O_pad)
    x_p = x.astype(jnp.float32)

    budget = _vmem_budget_bytes()
    slack = 2 << 20                      # Mosaic-internal scratch allowance
    bias_bytes = O_pad * 4

    # ---- pick resident-W vs K-tiled path, size the batch tile --------------
    w_resident_bytes = I * O_pad * w_elem            # single copy (Buffered(1))
    per_row_res = 2 * I * 4 + 2 * O_pad * out_elem   # dbl-buffered x + out rows
    avail_res = budget - slack - bias_bytes - w_resident_bytes
    resident_ok = avail_res >= min(rows, 128) * per_row_res

    if force_path == "resident":
        use_ktiled = False
    elif force_path == "ktiled":
        use_ktiled = True
    else:
        use_ktiled = not resident_ok

    if not use_ktiled:
        I_pad, TK = I, None
        tb_cap = max(avail_res // per_row_res, 8)
    else:
        TK = max(128, min(2048, _round_up(min(I, 512), 128)))
        I_pad = _round_up(I, TK)
        w_stream_bytes = 2 * TK * O_pad * w_elem     # dbl-buffered weight tiles
        per_row_kt = (2 * TK * 4                     # dbl-buffered x rows
                      + 2 * O_pad * out_elem         # dbl-buffered out rows
                      + O_pad * 4 + 4)               # f32 acc + xsq scratch
        avail_kt = budget - slack - bias_bytes - w_stream_bytes
        tb_cap = max(avail_kt // per_row_kt, 8)

    TB = int(min(tb_cap, 1024, rows))
    TB = max(TB - TB % 8, 8)
    # Keep >= 2 batch-grid steps when the batch allows it (pipelining; megacore).
    if TB >= rows and rows >= 16:
        TB = _round_up((rows + 1) // 2, 8)
    B_pad = _round_up(B, TB)

    pad_b, pad_i = B_pad - B, I_pad - I
    if pad_b or pad_i:
        x_p = jnp.pad(x_p, ((0, pad_b), (0, pad_i)))
    if pad_i:
        w_t = jnp.pad(w_t, ((0, pad_i), (0, 0)))     # zero rows -> zero contrib

    cost = pl.CostEstimate(
        flops=2 * B_pad * I_pad * O_pad,
        transcendentals=5 * B_pad,       # rsqrt x2, log, tanh (+sqrt) per row
        bytes_accessed=(B_pad * I_pad * 4 + I_pad * O_pad * w_elem
                        + O_pad * 4 + B_pad * O_pad * out_elem))
    vmem_limit = budget

    if not use_ktiled:
        kernel = functools.partial(_resident_kernel, bf16_matmul=use_bf16_matmul)

        def _call(single_buffer_resident):
            if single_buffer_resident:
                wt_spec = pl.BlockSpec((I_pad, O_pad), lambda i: (0, 0),
                                       pipeline_mode=pl.Buffered(1))
                b_spec = pl.BlockSpec((1, O_pad), lambda i: (0, 0),
                                      pipeline_mode=pl.Buffered(1))
            else:
                wt_spec = pl.BlockSpec((I_pad, O_pad), lambda i: (0, 0))
                b_spec = pl.BlockSpec((1, O_pad), lambda i: (0, 0))
            return pl.pallas_call(
                kernel,
                out_shape=jax.ShapeDtypeStruct((B_pad, O_pad), out_dtype),
                grid=(B_pad // TB,),
                in_specs=[pl.BlockSpec((TB, I_pad), lambda i: (i, 0)),  # x tiles
                          wt_spec,                                      # resident W^T
                          b_spec],                                      # resident bias
                out_specs=pl.BlockSpec((TB, O_pad), lambda i: (i, 0)),
                compiler_params=pltpu.CompilerParams(
                    dimension_semantics=("parallel",),
                    vmem_limit_bytes=vmem_limit),
                cost_estimate=cost,
            )(x_p, w_t, b_p)

        try:
            out = _call(True)
        except Exception:                # Buffered(1) unsupported -> default buffering
            out = _call(False)
    else:
        kernel = functools.partial(_ktiled_kernel, bf16_matmul=use_bf16_matmul)

        def _call_kt(single_buffer_bias):
            if single_buffer_bias:
                b_spec = pl.BlockSpec((1, O_pad), lambda i, k: (0, 0),
                                      pipeline_mode=pl.Buffered(1))
            else:
                b_spec = pl.BlockSpec((1, O_pad), lambda i, k: (0, 0))
            return pl.pallas_call(
                kernel,
                out_shape=jax.ShapeDtypeStruct((B_pad, O_pad), out_dtype),
                grid=(B_pad // TB, I_pad // TK),
                in_specs=[pl.BlockSpec((TB, TK), lambda i, k: (i, k)),      # x tiles
                          pl.BlockSpec((TK, O_pad), lambda i, k: (k, 0)),   # W^T tiles
                          b_spec],                                          # bias
                out_specs=pl.BlockSpec((TB, O_pad), lambda i, k: (i, 0)),
                scratch_shapes=[pltpu.VMEM((TB, O_pad), jnp.float32),       # acc
                                pltpu.VMEM((TB, 1), jnp.float32)],          # ||x||^2
                compiler_params=pltpu.CompilerParams(
                    dimension_semantics=("parallel", "arbitrary"),
                    vmem_limit_bytes=vmem_limit),
                cost_estimate=cost,
            )(x_p, w_t, b_p)

        try:
            out = _call_kt(True)
        except Exception:
            out = _call_kt(False)

    if B_pad != B or O_pad != O:
        out = out[:B, :O]
    return out


def _reference(x, W, bias):
    mx = x @ W.T
    x_norm = jnp.maximum(jnp.linalg.norm(x, axis=-1, keepdims=True), 1e-15)
    mx_norm = jnp.maximum(jnp.linalg.norm(mx, axis=-1, keepdims=True), 1e-15)
    sqrt_c = jnp.sqrt(CURVATURE_C)
    a = jnp.clip(sqrt_c * x_norm, -1.0 + 1e-7, 1.0 - 1e-7)
    artanh = 0.5 * jnp.log((1.0 + a) / (1.0 - a))
    res = jnp.tanh(mx_norm / x_norm * artanh) * mx / (mx_norm * sqrt_c)
    res = jnp.where(jnp.all(mx == 0.0, axis=-1, keepdims=True), 0.0, res)
    return res + bias[None, :]


if __name__ == "__main__":
    key = jax.random.PRNGKey(0)
    k_x, k_w, k_x2 = jax.random.split(key, 3)

    batch, input_dim, output_dim = 8, 32, 16

    # Points inside the unit Poincare ball (norm < 1).
    x_raw = jax.random.normal(k_x, (batch, input_dim), dtype=jnp.float32)
    x = 0.5 * x_raw / jnp.maximum(
        jnp.linalg.norm(x_raw, axis=-1, keepdims=True), 1e-6)

    # Kaiming-uniform-like init: U(-bound, bound), bound = sqrt(6 / fan_in);
    # bias zeros (matches nn.init.zeros_ in the module).
    bound = (6.0 / input_dim) ** 0.5
    W = jax.random.uniform(k_w, (output_dim, input_dim), dtype=jnp.float32,
                           minval=-bound, maxval=bound)
    bias = jnp.zeros((output_dim,), dtype=jnp.float32)

    out = jax.block_until_ready(hyperbolic_linear(x, W, bias))
    ref = _reference(x, W, bias)
    assert out.shape == (batch, output_dim)
    assert jnp.allclose(out, ref, atol=1e-5, rtol=1e-5), \
        float(jnp.max(jnp.abs(out - ref)))

    # Multi-step batch grid (pipelined) and the K-tiled fallback path.
    batch2 = 64
    x2_raw = jax.random.normal(k_x2, (batch2, input_dim), dtype=jnp.float32)
    x2 = 0.5 * x2_raw / jnp.maximum(
        jnp.linalg.norm(x2_raw, axis=-1, keepdims=True), 1e-6)
    ref2 = _reference(x2, W, bias)

    out2 = jax.block_until_ready(hyperbolic_linear(x2, W, bias))
    assert jnp.allclose(out2, ref2, atol=1e-5, rtol=1e-5), \
        float(jnp.max(jnp.abs(out2 - ref2)))

    out3 = jax.block_until_ready(
        hyperbolic_linear(x2, W, bias, force_path="ktiled"))
    assert jnp.allclose(out3, ref2, atol=1e-5, rtol=1e-5), \
        float(jnp.max(jnp.abs(out3 - ref2)))

    print("KERNEL_OK")
</pallas_src>

<mosaic_0001>
module attributes {stable_mosaic.version = 11 : i64} {
  func.func @_resident_kernel(%arg0: i32, %arg1: memref<8x32xf32, #tpu.memory_space<vmem>>, %arg2: memref<32x128xf32, #tpu.memory_space<vmem>>, %arg3: memref<1x128xf32, #tpu.memory_space<vmem>>, %arg4: memref<8x128xf32, #tpu.memory_space<vmem>>) attributes {dimension_semantics = [#tpu.dimension_semantics<parallel>], iteration_bounds = array<i64: 1>, scalar_prefetch = 0 : i64, scratch_operands = 0 : i64, tpu.core_type = #tpu.core_type<tc>, window_params = [{transform_indices = @transform_0, window_bounds = array<i64: 8, 32>}, {pipeline_mode = #tpu.pipeline_mode<synchronous>, transform_indices = @transform_1, window_bounds = array<i64: 32, 128>}, {pipeline_mode = #tpu.pipeline_mode<synchronous>, transform_indices = @transform_2, window_bounds = array<i64: 1, 128>}, {transform_indices = @transform_3, window_bounds = array<i64: 8, 128>}]} {
    %c0 = arith.constant 0 : index
    %c0_0 = arith.constant 0 : index
    %0 = vector.load %arg1[%c0, %c0_0] : memref<8x32xf32, #tpu.memory_space<vmem>>, vector<8x32xf32>
    %c0_1 = arith.constant 0 : index
    %c0_2 = arith.constant 0 : index
    %1 = vector.load %arg2[%c0_1, %c0_2] : memref<32x128xf32, #tpu.memory_space<vmem>>, vector<32x128xf32>
    %c0_3 = arith.constant 0 : index
    %c0_4 = arith.constant 0 : index
    %2 = vector.load %arg3[%c0_3, %c0_4] : memref<1x128xf32, #tpu.memory_space<vmem>>, vector<1x128xf32>
    %cst = arith.constant dense<0.000000e+00> : vector<8x128xf32>
    %3 = tpu.matmul %0, %1, %cst {dimension_numbers = #tpu.dot_dimension_numbers<[1], [0], [0], [1], [0, 0, 1, 1], [], []>} : vector<8x32xf32>, vector<32x128xf32>, vector<8x128xf32> -> vector<8x128xf32>
    %4 = arith.mulf %0, %0 : vector<8x32xf32>
    %cst_5 = arith.constant dense<0.000000e+00> : vector<8xf32>
    %5 = vector.multi_reduction <add>, %4, %cst_5 [1] : vector<8x32xf32> to vector<8xf32>
    %6 = vector.shape_cast %5 : vector<8xf32> to vector<8x1xf32>
    %7 = arith.mulf %3, %3 : vector<8x128xf32>
    %cst_6 = arith.constant dense<0.000000e+00> : vector<8xf32>
    %8 = vector.multi_reduction <add>, %7, %cst_6 [1] : vector<8x128xf32> to vector<8xf32>
    %9 = vector.shape_cast %8 : vector<8xf32> to vector<8x1xf32>
    %cst_7 = arith.constant 1.000000e-30 : f32
    %10 = vector.broadcast %cst_7 : f32 to vector<8x1xf32>
    %11 = arith.maximumf %6, %10 : vector<8x1xf32>
    %cst_8 = arith.constant 1.000000e-30 : f32
    %12 = vector.broadcast %cst_8 : f32 to vector<8x1xf32>
    %13 = arith.maximumf %9, %12 : vector<8x1xf32>
    %14 = math.sqrt %11 : vector<8x1xf32>
    %15 = math.sqrt %13 : vector<8x1xf32>
    %16 = math.rsqrt %11 : vector<8x1xf32>
    %17 = math.rsqrt %13 : vector<8x1xf32>
    %cst_9 = arith.constant 1.000000e+00 : f32
    %18 = vector.broadcast %cst_9 : f32 to vector<8x1xf32>
    %19 = arith.mulf %18, %14 : vector<8x1xf32>
    %cst_10 = arith.constant -0.99999988 : f32
    %cst_11 = arith.constant 0.99999988 : f32
    %20 = vector.broadcast %cst_10 : f32 to vector<8x1xf32>
    %21 = arith.maximumf %20, %19 : vector<8x1xf32>
    %22 = vector.broadcast %cst_11 : f32 to vector<8x1xf32>
    %23 = arith.minimumf %22, %21 : vector<8x1xf32>
    %cst_12 = arith.constant 1.000000e+00 : f32
    %24 = vector.broadcast %cst_12 : f32 to vector<8x1xf32>
    %25 = arith.addf %24, %23 : vector<8x1xf32>
    %cst_13 = arith.constant 1.000000e+00 : f32
    %26 = vector.broadcast %cst_13 : f32 to vector<8x1xf32>
    %27 = arith.subf %26, %23 : vector<8x1xf32>
    %28 = arith.divf %25, %27 : vector<8x1xf32>
    %29 = math.log %28 : vector<8x1xf32>
    %cst_14 = arith.constant 5.000000e-01 : f32
    %30 = vector.broadcast %cst_14 : f32 to vector<8x1xf32>
    %31 = arith.mulf %30, %29 : vector<8x1xf32>
    %32 = arith.mulf %15, %16 : vector<8x1xf32>
    %33 = arith.mulf %32, %31 : vector<8x1xf32>
    %34 = math.tanh %33 : vector<8x1xf32>
    %cst_15 = arith.constant 1.000000e+00 : f32
    %35 = vector.broadcast %cst_15 : f32 to vector<8x1xf32>
    %36 = arith.mulf %17, %35 : vector<8x1xf32>
    %37 = arith.mulf %34, %36 : vector<8x1xf32>
    %cst_16 = arith.constant 0.000000e+00 : f32
    %38 = vector.broadcast %cst_16 : f32 to vector<8x1xf32>
    %39 = arith.cmpf oeq, %9, %38 : vector<8x1xf32>
    %cst_17 = arith.constant 0.000000e+00 : f32
    %40 = vector.broadcast %cst_17 : f32 to vector<8x1xf32>
    %41 = arith.select %39, %40, %37 : vector<8x1xi1>, vector<8x1xf32>
    %42 = vector.broadcast %41 : vector<8x1xf32> to vector<8x128xf32>
    %43 = arith.mulf %42, %3 : vector<8x128xf32>
    %44 = vector.broadcast %2 : vector<1x128xf32> to vector<8x128xf32>
    %45 = arith.addf %43, %44 : vector<8x128xf32>
    %c0_18 = arith.constant 0 : index
    %c0_19 = arith.constant 0 : index
    %46 = vector.load %arg4[%c0_18, %c0_19] : memref<8x128xf32, #tpu.memory_space<vmem>>, vector<8x128xf32>
    tpu.vector_store %arg4[%c0_18, %c0_19], %45 {strides = array<i32>} : memref<8x128xf32, #tpu.memory_space<vmem>>, vector<8x128xf32>,
    return
  }
  func.func @transform_0(%arg0: i32) -> (i32, i32) {
    %c0_i32 = arith.constant 0 : i32
    %c0_i32_0 = arith.constant 0 : i32
    return %arg0, %c0_i32 : i32, i32
  }
  func.func @transform_1(%arg0: i32) -> (i32, i32) {
    %c0_i32 = arith.constant 0 : i32
    %c0_i32_0 = arith.constant 0 : i32
    %c0_i32_1 = arith.constant 0 : i32
    return %c0_i32, %c0_i32_0 : i32, i32
  }
  func.func @transform_2(%arg0: i32) -> (i32, i32) {
    %c0_i32 = arith.constant 0 : i32
    %c0_i32_0 = arith.constant 0 : i32
    %c0_i32_1 = arith.constant 0 : i32
    return %c0_i32, %c0_i32_0 : i32, i32
  }
  func.func @transform_3(%arg0: i32) -> (i32, i32) {
    %c0_i32 = arith.constant 0 : i32
    %c0_i32_0 = arith.constant 0 : i32
    return %arg0, %c0_i32 : i32, i32
  }
}

module attributes {stable_mosaic.version = 11 : i64} {
  func.func @_resident_kernel(%arg0: i32, %arg1: memref<8x32xf32, #tpu.memory_space<vmem>>, %arg2: memref<32x128xf32, #tpu.memory_space<vmem>>, %arg3: memref<1x128xf32, #tpu.memory_space<vmem>>, %arg4: memref<8x128xf32, #tpu.memory_space<vmem>>) attributes {dimension_semantics = [#tpu.dimension_semantics<parallel>], iteration_bounds = array<i64: 1>, scalar_prefetch = 0 : i64, scratch_operands = 0 : i64, tpu.core_type = #tpu.core_type<tc>, window_params = [{transform_indices = @transform_0, window_bounds = array<i64: 8, 32>}, {pipeline_mode = #tpu.pipeline_mode<synchronous>, transform_indices = @transform_1, window_bounds = array<i64: 32, 128>}, {pipeline_mode = #tpu.pipeline_mode<synchronous>, transform_indices = @transform_2, window_bounds = array<i64: 1, 128>}, {transform_indices = @transform_3, window_bounds = array<i64: 8, 128>}]} {
    %c0 = arith.constant 0 : index
    %c0_0 = arith.constant 0 : index
    %0 = vector.load %arg1[%c0, %c0_0] : memref<8x32xf32, #tpu.memory_space<vmem>>, vector<8x32xf32>
    %c0_1 = arith.constant 0 : index
    %c0_2 = arith.constant 0 : index
    %1 = vector.load %arg2[%c0_1, %c0_2] : memref<32x128xf32, #tpu.memory_space<vmem>>, vector<32x128xf32>
    %c0_3 = arith.constant 0 : index
    %c0_4 = arith.constant 0 : index
    %2 = vector.load %arg3[%c0_3, %c0_4] : memref<1x128xf32, #tpu.memory_space<vmem>>, vector<1x128xf32>
    %cst = arith.constant dense<0.000000e+00> : vector<8x128xf32>
    %3 = tpu.matmul %0, %1, %cst {dimension_numbers = #tpu.dot_dimension_numbers<[1], [0], [0], [1], [0, 0, 1, 1], [], []>} : vector<8x32xf32>, vector<32x128xf32>, vector<8x128xf32> -> vector<8x128xf32>
    %4 = arith.mulf %0, %0 : vector<8x32xf32>
    %cst_5 = arith.constant dense<0.000000e+00> : vector<8xf32>
    %5 = vector.multi_reduction <add>, %4, %cst_5 [1] : vector<8x32xf32> to vector<8xf32>
    %6 = vector.shape_cast %5 : vector<8xf32> to vector<8x1xf32>
    %7 = arith.mulf %3, %3 : vector<8x128xf32>
    %cst_6 = arith.constant dense<0.000000e+00> : vector<8xf32>
    %8 = vector.multi_reduction <add>, %7, %cst_6 [1] : vector<8x128xf32> to vector<8xf32>
    %9 = vector.shape_cast %8 : vector<8xf32> to vector<8x1xf32>
    %cst_7 = arith.constant 1.000000e-30 : f32
    %10 = vector.broadcast %cst_7 : f32 to vector<8x1xf32>
    %11 = arith.maximumf %6, %10 : vector<8x1xf32>
    %cst_8 = arith.constant 1.000000e-30 : f32
    %12 = vector.broadcast %cst_8 : f32 to vector<8x1xf32>
    %13 = arith.maximumf %9, %12 : vector<8x1xf32>
    %14 = math.sqrt %11 : vector<8x1xf32>
    %15 = math.sqrt %13 : vector<8x1xf32>
    %16 = math.rsqrt %11 : vector<8x1xf32>
    %17 = math.rsqrt %13 : vector<8x1xf32>
    %cst_9 = arith.constant 1.000000e+00 : f32
    %18 = vector.broadcast %cst_9 : f32 to vector<8x1xf32>
    %19 = arith.mulf %18, %14 : vector<8x1xf32>
    %cst_10 = arith.constant -0.99999988 : f32
    %cst_11 = arith.constant 0.99999988 : f32
    %20 = vector.broadcast %cst_10 : f32 to vector<8x1xf32>
    %21 = arith.maximumf %20, %19 : vector<8x1xf32>
    %22 = vector.broadcast %cst_11 : f32 to vector<8x1xf32>
    %23 = arith.minimumf %22, %21 : vector<8x1xf32>
    %cst_12 = arith.constant 1.000000e+00 : f32
    %24 = vector.broadcast %cst_12 : f32 to vector<8x1xf32>
    %25 = arith.addf %24, %23 : vector<8x1xf32>
    %cst_13 = arith.constant 1.000000e+00 : f32
    %26 = vector.broadcast %cst_13 : f32 to vector<8x1xf32>
    %27 = arith.subf %26, %23 : vector<8x1xf32>
    %28 = arith.divf %25, %27 : vector<8x1xf32>
    %29 = math.log %28 : vector<8x1xf32>
    %cst_14 = arith.constant 5.000000e-01 : f32
    %30 = vector.broadcast %cst_14 : f32 to vector<8x1xf32>
    %31 = arith.mulf %30, %29 : vector<8x1xf32>
    %32 = arith.mulf %15, %16 : vector<8x1xf32>
    %33 = arith.mulf %32, %31 : vector<8x1xf32>
    %34 = math.tanh %33 : vector<8x1xf32>
    %cst_15 = arith.constant 1.000000e+00 : f32
    %35 = vector.broadcast %cst_15 : f32 to vector<8x1xf32>
    %36 = arith.mulf %17, %35 : vector<8x1xf32>
    %37 = arith.mulf %34, %36 : vector<8x1xf32>
    %cst_16 = arith.constant 0.000000e+00 : f32
    %38 = vector.broadcast %cst_16 : f32 to vector<8x1xf32>
    %39 = arith.cmpf oeq, %9, %38 : vector<8x1xf32>
    %cst_17 = arith.constant 0.000000e+00 : f32
    %40 = vector.broadcast %cst_17 : f32 to vector<8x1xf32>
    %41 = arith.select %39, %40, %37 : vector<8x1xi1>, vector<8x1xf32>
    %42 = vector.broadcast %41 : vector<8x1xf32> to vector<8x128xf32>
    %43 = arith.mulf %42, %3 : vector<8x128xf32>
    %44 = vector.broadcast %2 : vector<1x128xf32> to vector<8x128xf32>
    %45 = arith.addf %43, %44 : vector<8x128xf32>
    %c0_18 = arith.constant 0 : index
    %c0_19 = arith.constant 0 : index
    %46 = vector.load %arg4[%c0_18, %c0_19] : memref<8x128xf32, #tpu.memory_space<vmem>>, vector<8x128xf32>
    tpu.vector_store %arg4[%c0_18, %c0_19], %45 {strides = array<i32>} : memref<8x128xf32, #tpu.memory_space<vmem>>, vector<8x128xf32>,
    return
  }
  func.func @transform_0(%arg0: i32) -> (i32, i32) {
    %c0_i32 = arith.constant 0 : i32
    %c0_i32_0 = arith.constant 0 : i32
    return %arg0, %c0_i32 : i32, i32
  }
  func.func @transform_1(%arg0: i32) -> (i32, i32) {
    %c0_i32 = arith.constant 0 : i32
    %c0_i32_0 = arith.constant 0 : i32
    %c0_i32_1 = arith.constant 0 : i32
    return %c0_i32, %c0_i32_0 : i32, i32
  }
  func.func @transform_2(%arg0: i32) -> (i32, i32) {
    %c0_i32 = arith.constant 0 : i32
    %c0_i32_0 = arith.constant 0 : i32
    %c0_i32_1 = arith.constant 0 : i32
    return %c0_i32, %c0_i32_0 : i32, i32
  }
  func.func @transform_3(%arg0: i32) -> (i32, i32) {
    %c0_i32 = arith.constant 0 : i32
    %c0_i32_0 = arith.constant 0 : i32
    return %arg0, %c0_i32 : i32, i32
  }
}

</mosaic_0001>

<bundles_post_ra>
// kernel: tpu_custom_call.1
= control target key start
LH: loop header
LB: loop body
LE: loop exit
PB: predicated region body
PF: predicated region fallthrough
CT: control target
= control target key end

     0   :  { %8 = vsyncpa [#allocation3], 0  ;;  %s375_s0 = inlined_call_operand.hbm [shape: f32[8,32], index: 0, kind: input, shape index: {}]   ;;  %s376_s1 = inlined_call_operand.hbm [shape: f32[32,128], index: 1, kind: input, shape index: {}]   ;;  %s377_s2 = inlined_call_operand.vmem [shape: f32[1,128], index: 2, kind: input, shape index: {}]   ;;  %s378_s3 = inlined_call_operand.hbm [shape: f32[8,128], index: 3, kind: output, shape index: {}]  }
   0x1   :  { %9 = vsyncpa [#allocation6], 0 }
   0x2   :  { %10 = vsyncpa [#allocation4], 0  ;;  %s301_s12 = smov [#allocation2]   ;;  %s302_s14 = smov [#allocation5]  }
   0x3   :  { %s17_s13 = sshll.u32 %s301_s12, 4  ;;  %s26_s15 = sshll.u32 %s302_s14, 4  ;;  %s18_s13 = int_to_ptr.vmem [resolvable:$true] %s17_s13  ;;  %s329_s15 = int_to_ptr.vmem [resolvable:$true] %s26_s15 }
   0x4   :  { %s229_s18 = scalar_lea.hbm %s375_s0, 128 }
   0x5   :  { %p230_p0 = scmp.ne.s32.totalorder %s375_s0, %s229_s18  ;;  %p233_p1 = scmp.lt.u32.totalorder %s229_s18, %s375_s0 }
   0x7   :  { %p235_p2 = pnand %p233_p1, %p230_p0 }
   0x9   :  { %238 = shalt.err (!%p235_p2)
}
   0xa   :  { %s239_s23 = scalar_lea.vmem %s18_s13, 128  ;;  %p244_p4 = scmp.lt.s32.totalorder %s18_s13, %s18_s13 }
   0xb   :  { %p240_p3 = scmp.ne.s32.totalorder %s18_s13, %s239_s23  ;;  %p245_p5 = scmp.lt.s32.totalorder %s239_s23, %s239_s23 }
   0xd   :  { %p246_p6 = por %p245_p5, %p244_p4 }
   0xf   :  { %p247_p7 = pnand %p246_p6, %p240_p3 }
  0x11   :  { %250 = shalt.err (!%p247_p7)
}
  0x12   :  { %20 = dma.hbm_to_vmem [thread:$0]  %s375_s0, 128, %s18_s13, [#allocation3]  }
  0x13   :  { %s251_s28 = scalar_lea.hbm %s376_s1, 512 }
  0x14   :  { %p252_p8 = scmp.ne.s32.totalorder %s376_s1, %s251_s28  ;;  %p255_p9 = scmp.lt.u32.totalorder %s251_s28, %s376_s1 }
  0x16   :  { %p257_p10 = pnand %p255_p9, %p252_p8 }
  0x18   :  { %260 = shalt.err (!%p257_p10)
}
  0x19   :  { %s261_s6 = scalar_lea.vmem %s329_s15, 512  ;;  %p266_p12 = scmp.lt.s32.totalorder %s329_s15, %s329_s15 }
  0x1a   :  { %p262_p11 = scmp.ne.s32.totalorder %s329_s15, %s261_s6  ;;  %p267_p13 = scmp.lt.s32.totalorder %s261_s6, %s261_s6 }
  0x1c   :  { %p268_p0 = por %p267_p13, %p266_p12 }
  0x1e   :  { %p269_p1 = pnand %p268_p0, %p262_p11 }
  0x20   :  { %272 = shalt.err (!%p269_p1)
}
  0x21   :  { %s303_s0 = smov 128   ;;  %s304_s7 = smov 8  }
  0x22   :  { %32 = dma.hbm_to_vmem [thread:$0]  %s376_s1, 512, %s329_s15, [#allocation6], %s303_s0, %s303_s0, %s304_s7  }
  0x23   :  { %295 = dma.done.wait [#allocation3], 128  }
  0x24   :  { %296 = vsyncadd [#allocation3], 4294967168 }
  0x25   :  { %297 = dma.done.wait [#allocation6], 512  }
  0x26   :  { %298 = vsyncadd [#allocation6], 4294966784  ;;  %v305_v0 = vmov 0.0|0.0   ;;  %vm306_vm0 = vmmov 0   ;;  %v307_v1 = vmov 0.0   ;;  %v42_v2 = vld [vmem:[#allocation5] sm:$0xff] }
  0x27   :  { %205 = vmatprep.subr.bf16.mxu0 %v305_v0  ;;  %202 = vmatprep.mubr.msk.f32.mxu0 %vm306_vm0, %v307_v1  ;;  %v43_v3 = vld [vmem:[#allocation5 + $0x8] sm:$0xff]  ;;  %v44_v4 = vld [vmem:[#allocation5 + $0x10] sm:$0xff]  ;;  %v45_v6 = vld [vmem:[#allocation5 + $0x18] sm:$0xff]  ;;  %vm47_vm1 = vcmask 261120   ;;  %s308_s11 = smov [#allocation7]  }
  0x28   :  { %v206_v5 = vpack.c.bf16 %v43_v3, %v42_v2  ;;  %v41_v7 = vld [vmem:[#allocation2] sm:$0xff]  ;;  %v209_v9 = vpack.c.bf16 %v45_v6, %v44_v4  ;;  %s176_s12 = sshll.u32 %s308_s11, 4  ;;  %s177_s12 = int_to_ptr.vmem [resolvable:$true] %s176_s12 }
  0x29   :  { %v121_v8 = vmul.f32 %v41_v7, %v41_v7  ;;  %v188_v41 = vld [vmem:[%s377_s2] ss:$0 sm:$0xff]  ;;  %s273_s13 = scalar_lea.vmem %s177_s12, 128  ;;  %p278_p3 = scmp.lt.s32.totalorder %s177_s12, %s177_s12 }
  0x2a   :  { %207 = vmatpush3.bf16.msra.mxu0 %v206_v5  ;;  %p274_p2 = scmp.ne.s32.totalorder %s177_s12, %s273_s13  ;;  %p279_p4 = scmp.lt.s32.totalorder %s273_s13, %s273_s13 }
  0x2b   :  { %208 = vmatprep.subr.bf16.mxu0 %v305_v0  ;;  %v122_v10 = vsel %vm47_vm1, %v121_v8, 0.0 }
  0x2c   :  { %123 = vadd.xlane.f32.xlu0 %v122_v10  ;;  %p280_p5 = por %p279_p4, %p278_p3 }
  0x2e   :  { %210 = vmatpush3.bf16.msra.mxu0 %v209_v9  ;;  %p281_p6 = pnand %p280_p5, %p274_p2 }
  0x31   :  { %203 = vmatmul.mubr.msk.f32.vlgmr.msra.gmra.mrb[0].mxu0 %vm47_vm1, %v41_v7 }
  0xb9   :  { %v124_v14 = vpop.xlane.xlu0 %123 }
  0xba   :  { %v128_v15 = vmax.f32 %v124_v14, 1e-30 }
  0xbc   :  { %219 = vrsqrt.f32 %v128_v15  ;;  %vm132_vm2 = vcmp.eq.f32.partialorder %v128_v15, inf  ;;  %v135_v18 = vand.u32 2147483648, %v128_v15  ;;  %vm134_vm3 = vcmp.eq.f32.partialorder %v128_v15, 0.0 }
  0xc6   :  { %v220_v16 = vpop.eup %219 }
  0xc7   :  { %v131_v17 = vmul.f32 %v220_v16, %v128_v15 }
  0xc9   :  { %v133_v19 = vsel %vm132_vm2, %v128_v15, %v131_v17 }
  0xca   :  { %v136_v20 = vsel %vm134_vm3, %v135_v18, %v133_v19 }
  0xcb   :  { %v187_v21 = vclamps-f32 %v136_v20, 0.9999999 }
  0xcd   :  { %v149_v22 = vsub.f32 1.0, %v187_v21  ;;  %v148_v23 = vadd.f32 1.0, %v187_v21 }
  0xcf   :  { %221 = vrcp.f32 %v149_v22 }
  0xd9   :  { %v222_v24 = vpop.eup %221 }
  0xda   :  { %v151_v25 = vmul.f32 %v222_v24, %v148_v23 }
  0xdc   :  { %223 = vlog2.f32 %v151_v25 }
  0xe6   :  { %v224_v28 = vpop.eup %223 }
  0xe7   :  { %v153_v30 = vmul.f32 0.6931472, %v224_v28 }
  0xe9   :  { %v154_v35 = vmul.f32 0.5, %v153_v30 }
 0x104   :  { %v117_v11 = vpop.f32.mrb[0].mxu0 }
 0x105   :  { %v204_v12 = vpop.f32.mrb[1].mxu0  ;;  %v125_v13 = vmul.f32 %v117_v11, %v117_v11 }
 0x107   :  { %126 = vadd.xlane.f32.xlu0 %v125_v13 }
 0x194   :  { %v127_v26 = vpop.xlane.xlu0 %126 }
 0x195   :  { %v129_v27 = vmax.f32 %v127_v26, 1e-30  ;;  %vm159_vm6 = vcmp.eq.f32.partialorder %v127_v26, 0.0 }
 0x197   :  { %225 = vrsqrt.f32 %v129_v27  ;;  %vm139_vm4 = vcmp.eq.f32.partialorder %v129_v27, inf  ;;  %v142_v32 = vand.u32 2147483648, %v129_v27  ;;  %vm141_vm5 = vcmp.eq.f32.partialorder %v129_v27, 0.0 }
 0x1a1   :  { %v226_v29 = vpop.eup %225 }
 0x1a2   :  { %v138_v31 = vmul.f32 %v226_v29, %v129_v27 }
 0x1a4   :  { %v140_v33 = vsel %vm139_vm4, %v129_v27, %v138_v31 }
 0x1a5   :  { %v143_v34 = vsel %vm141_vm5, %v142_v32, %v140_v33 }
 0x1a6   :  { %v155_v36 = vmul.f32 %v220_v16, %v143_v34 }
 0x1a8   :  { %v156_v37 = vmul.f32 %v155_v36, %v154_v35 }
 0x1aa   :  { %227 = vtanh.f32 %v156_v37 }
 0x1b4   :  { %v228_v38 = vpop.eup %227 }
 0x1b5   :  { %v158_v39 = vmul.f32 %v228_v38, %v226_v29 }
 0x1b7   :  { %v160_v40 = vsel %vm159_vm6, 0.0, %v158_v39 }
 0x1b8   :  { %v161_v42 = vmul.f32 %v160_v40, %v117_v11 }
 0x1ba   :  { %v168_v43 = vadd.f32 %v188_v41, %v161_v42 }
 0x1bc   :  { %169 = vst [vmem:[#allocation7] sm:$0xff] %v168_v43 }
 0x1bd   :  { %284 = shalt.err (!%p281_p6)
}
 0x1be   :  { %s285_s16 = scalar_lea.hbm %s378_s3, 128 }
 0x1bf   :  { %p286_p7 = scmp.ne.s32.totalorder %s378_s3, %s285_s16  ;;  %p289_p8 = scmp.lt.u32.totalorder %s285_s16, %s378_s3 }
 0x1c1   :  { %p291_p9 = pnand %p289_p8, %p286_p7 }
 0x1c3   :  { %294 = shalt.err (!%p291_p9)
}
 0x1c4   :  { %179 = dma.vmem_to_hbm [thread:$0]  %s177_s12, 128, %s378_s3, [#allocation4]  }
 0x1c5   :  { %299 = dma.done.wait [#allocation4], 128  }
 0x1c6   :  { %300 = vsyncadd [#allocation4], 4294967168 }
 0x1c7   :  { %183 = vsyncpa [#allocation3], 1 }
 0x1c8   :  { %184 = vsyncpa [#allocation6], 1 }
 0x1c9   :  { %185 = vsyncpa [#allocation4], 1 }

// kernel: tpu_custom_call.1
= control target key start
LH: loop header
LB: loop body
LE: loop exit
PB: predicated region body
PF: predicated region fallthrough
CT: control target
= control target key end

     0   :  { %8 = vsyncpa [#allocation3], 0  ;;  %s375_s0 = inlined_call_operand.hbm [shape: f32[8,32], index: 0, kind: input, shape index: {}]   ;;  %s376_s1 = inlined_call_operand.hbm [shape: f32[32,128], index: 1, kind: input, shape index: {}]   ;;  %s377_s2 = inlined_call_operand.vmem [shape: f32[1,128], index: 2, kind: input, shape index: {}]   ;;  %s378_s3 = inlined_call_operand.hbm [shape: f32[8,128], index: 3, kind: output, shape index: {}]  }
   0x1   :  { %9 = vsyncpa [#allocation6], 0 }
   0x2   :  { %10 = vsyncpa [#allocation4], 0  ;;  %s301_s12 = smov [#allocation2]   ;;  %s302_s14 = smov [#allocation5]  }
   0x3   :  { %s17_s13 = sshll.u32 %s301_s12, 4  ;;  %s26_s15 = sshll.u32 %s302_s14, 4  ;;  %s18_s13 = int_to_ptr.vmem [resolvable:$true] %s17_s13  ;;  %s329_s15 = int_to_ptr.vmem [resolvable:$true] %s26_s15 }
   0x4   :  { %s229_s18 = scalar_lea.hbm %s375_s0, 128 }
   0x5   :  { %p230_p0 = scmp.ne.s32.totalorder %s375_s0, %s229_s18  ;;  %p233_p1 = scmp.lt.u32.totalorder %s229_s18, %s375_s0 }
   0x7   :  { %p235_p2 = pnand %p233_p1, %p230_p0 }
   0x9   :  { %238 = shalt.err (!%p235_p2)
}
   0xa   :  { %s239_s23 = scalar_lea.vmem %s18_s13, 128  ;;  %p244_p4 = scmp.lt.s32.totalorder %s18_s13, %s18_s13 }
   0xb   :  { %p240_p3 = scmp.ne.s32.totalorder %s18_s13, %s239_s23  ;;  %p245_p5 = scmp.lt.s32.totalorder %s239_s23, %s239_s23 }
   0xd   :  { %p246_p6 = por %p245_p5, %p244_p4 }
   0xf   :  { %p247_p7 = pnand %p246_p6, %p240_p3 }
  0x11   :  { %250 = shalt.err (!%p247_p7)
}
  0x12   :  { %20 = dma.hbm_to_vmem [thread:$0]  %s375_s0, 128, %s18_s13, [#allocation3]  }
  0x13   :  { %s251_s28 = scalar_lea.hbm %s376_s1, 512 }
  0x14   :  { %p252_p8 = scmp.ne.s32.totalorder %s376_s1, %s251_s28  ;;  %p255_p9 = scmp.lt.u32.totalorder %s251_s28, %s376_s1 }
  0x16   :  { %p257_p10 = pnand %p255_p9, %p252_p8 }
  0x18   :  { %260 = shalt.err (!%p257_p10)
}
  0x19   :  { %s261_s6 = scalar_lea.vmem %s329_s15, 512  ;;  %p266_p12 = scmp.lt.s32.totalorder %s329_s15, %s329_s15 }
  0x1a   :  { %p262_p11 = scmp.ne.s32.totalorder %s329_s15, %s261_s6  ;;  %p267_p13 = scmp.lt.s32.totalorder %s261_s6, %s261_s6 }
  0x1c   :  { %p268_p0 = por %p267_p13, %p266_p12 }
  0x1e   :  { %p269_p1 = pnand %p268_p0, %p262_p11 }
  0x20   :  { %272 = shalt.err (!%p269_p1)
}
  0x21   :  { %s303_s0 = smov 128   ;;  %s304_s7 = smov 8  }
  0x22   :  { %32 = dma.hbm_to_vmem [thread:$0]  %s376_s1, 512, %s329_s15, [#allocation6], %s303_s0, %s303_s0, %s304_s7  }
  0x23   :  { %295 = dma.done.wait [#allocation3], 128  }
  0x24   :  { %296 = vsyncadd [#allocation3], 4294967168 }
  0x25   :  { %297 = dma.done.wait [#allocation6], 512  }
  0x26   :  { %298 = vsyncadd [#allocation6], 4294966784  ;;  %v305_v0 = vmov 0.0|0.0   ;;  %vm306_vm0 = vmmov 0   ;;  %v307_v1 = vmov 0.0   ;;  %v42_v2 = vld [vmem:[#allocation5] sm:$0xff] }
  0x27   :  { %205 = vmatprep.subr.bf16.mxu0 %v305_v0  ;;  %202 = vmatprep.mubr.msk.f32.mxu0 %vm306_vm0, %v307_v1  ;;  %v43_v3 = vld [vmem:[#allocation5 + $0x8] sm:$0xff]  ;;  %v44_v4 = vld [vmem:[#allocation5 + $0x10] sm:$0xff]  ;;  %v45_v6 = vld [vmem:[#allocation5 + $0x18] sm:$0xff]  ;;  %vm47_vm1 = vcmask 261120   ;;  %s308_s11 = smov [#allocation7]  }
  0x28   :  { %v206_v5 = vpack.c.bf16 %v43_v3, %v42_v2  ;;  %v41_v7 = vld [vmem:[#allocation2] sm:$0xff]  ;;  %v209_v9 = vpack.c.bf16 %v45_v6, %v44_v4  ;;  %s176_s12 = sshll.u32 %s308_s11, 4  ;;  %s177_s12 = int_to_ptr.vmem [resolvable:$true] %s176_s12 }
  0x29   :  { %v121_v8 = vmul.f32 %v41_v7, %v41_v7  ;;  %v188_v41 = vld [vmem:[%s377_s2] ss:$0 sm:$0xff]  ;;  %s273_s13 = scalar_lea.vmem %s177_s12, 128  ;;  %p278_p3 = scmp.lt.s32.totalorder %s177_s12, %s177_s12 }
  0x2a   :  { %207 = vmatpush3.bf16.msra.mxu0 %v206_v5  ;;  %p274_p2 = scmp.ne.s32.totalorder %s177_s12, %s273_s13  ;;  %p279_p4 = scmp.lt.s32.totalorder %s273_s13, %s273_s13 }
  0x2b   :  { %208 = vmatprep.subr.bf16.mxu0 %v305_v0  ;;  %v122_v10 = vsel %vm47_vm1, %v121_v8, 0.0 }
  0x2c   :  { %123 = vadd.xlane.f32.xlu0 %v122_v10  ;;  %p280_p5 = por %p279_p4, %p278_p3 }
  0x2e   :  { %210 = vmatpush3.bf16.msra.mxu0 %v209_v9  ;;  %p281_p6 = pnand %p280_p5, %p274_p2 }
  0x31   :  { %203 = vmatmul.mubr.msk.f32.vlgmr.msra.gmra.mrb[0].mxu0 %vm47_vm1, %v41_v7 }
  0xb9   :  { %v124_v14 = vpop.xlane.xlu0 %123 }
  0xba   :  { %v128_v15 = vmax.f32 %v124_v14, 1e-30 }
  0xbc   :  { %219 = vrsqrt.f32 %v128_v15  ;;  %vm132_vm2 = vcmp.eq.f32.partialorder %v128_v15, inf  ;;  %v135_v18 = vand.u32 2147483648, %v128_v15  ;;  %vm134_vm3 = vcmp.eq.f32.partialorder %v128_v15, 0.0 }
  0xc6   :  { %v220_v16 = vpop.eup %219 }
  0xc7   :  { %v131_v17 = vmul.f32 %v220_v16, %v128_v15 }
  0xc9   :  { %v133_v19 = vsel %vm132_vm2, %v128_v15, %v131_v17 }
  0xca   :  { %v136_v20 = vsel %vm134_vm3, %v135_v18, %v133_v19 }
  0xcb   :  { %v187_v21 = vclamps-f32 %v136_v20, 0.9999999 }
  0xcd   :  { %v149_v22 = vsub.f32 1.0, %v187_v21  ;;  %v148_v23 = vadd.f32 1.0, %v187_v21 }
  0xcf   :  { %221 = vrcp.f32 %v149_v22 }
  0xd9   :  { %v222_v24 = vpop.eup %221 }
  0xda   :  { %v151_v25 = vmul.f32 %v222_v24, %v148_v23 }
  0xdc   :  { %223 = vlog2.f32 %v151_v25 }
  0xe6   :  { %v224_v28 = vpop.eup %223 }
  0xe7   :  { %v153_v30 = vmul.f32 0.6931472, %v224_v28 }
  0xe9   :  { %v154_v35 = vmul.f32 0.5, %v153_v30 }
 0x104   :  { %v117_v11 = vpop.f32.mrb[0].mxu0 }
 0x105   :  { %v204_v12 = vpop.f32.mrb[1].mxu0  ;;  %v125_v13 = vmul.f32 %v117_v11, %v117_v11 }
 0x107   :  { %126 = vadd.xlane.f32.xlu0 %v125_v13 }
 0x194   :  { %v127_v26 = vpop.xlane.xlu0 %126 }
 0x195   :  { %v129_v27 = vmax.f32 %v127_v26, 1e-30  ;;  %vm159_vm6 = vcmp.eq.f32.partialorder %v127_v26, 0.0 }
 0x197   :  { %225 = vrsqrt.f32 %v129_v27  ;;  %vm139_vm4 = vcmp.eq.f32.partialorder %v129_v27, inf  ;;  %v142_v32 = vand.u32 2147483648, %v129_v27  ;;  %vm141_vm5 = vcmp.eq.f32.partialorder %v129_v27, 0.0 }
 0x1a1   :  { %v226_v29 = vpop.eup %225 }
 0x1a2   :  { %v138_v31 = vmul.f32 %v226_v29, %v129_v27 }
 0x1a4   :  { %v140_v33 = vsel %vm139_vm4, %v129_v27, %v138_v31 }
 0x1a5   :  { %v143_v34 = vsel %vm141_vm5, %v142_v32, %v140_v33 }
 0x1a6   :  { %v155_v36 = vmul.f32 %v220_v16, %v143_v34 }
 0x1a8   :  { %v156_v37 = vmul.f32 %v155_v36, %v154_v35 }
 0x1aa   :  { %227 = vtanh.f32 %v156_v37 }
 0x1b4   :  { %v228_v38 = vpop.eup %227 }
 0x1b5   :  { %v158_v39 = vmul.f32 %v228_v38, %v226_v29 }
 0x1b7   :  { %v160_v40 = vsel %vm159_vm6, 0.0, %v158_v39 }
 0x1b8   :  { %v161_v42 = vmul.f32 %v160_v40, %v117_v11 }
 0x1ba   :  { %v168_v43 = vadd.f32 %v188_v41, %v161_v42 }
 0x1bc   :  { %169 = vst [vmem:[#allocation7] sm:$0xff] %v168_v43 }
 0x1bd   :  { %284 = shalt.err (!%p281_p6)
}
 0x1be   :  { %s285_s16 = scalar_lea.hbm %s378_s3, 128 }
 0x1bf   :  { %p286_p7 = scmp.ne.s32.totalorder %s378_s3, %s285_s16  ;;  %p289_p8 = scmp.lt.u32.totalorder %s285_s16, %s378_s3 }
 0x1c1   :  { %p291_p9 = pnand %p289_p8, %p286_p7 }
 0x1c3   :  { %294 = shalt.err (!%p291_p9)
}
 0x1c4   :  { %179 = dma.vmem_to_hbm [thread:$0]  %s177_s12, 128, %s378_s3, [#allocation4]  }
 0x1c5   :  { %299 = dma.done.wait [#allocation4], 128  }
 0x1c6   :  { %300 = vsyncadd [#allocation4], 4294967168 }
 0x1c7   :  { %183 = vsyncpa [#allocation3], 1 }
 0x1c8   :  { %184 = vsyncpa [#allocation6], 1 }
 0x1c9   :  { %185 = vsyncpa [#allocation4], 1 }

</bundles_post_ra>
